<compile_context>
chip_gen: v7x
topology: tpu7x:2x2x1
jax: 0.10.0
libtpu: 0.0.40
codegen_flags: <defaults>
</compile_context>

<pallas_src>
from functools import partial

import jax
import jax.numpy as jnp
from jax.experimental import pallas as pl
from jax.experimental.pallas import tpu as pltpu


def _round_up(v, m):
    return (v + m - 1) // m * m


def conv1d_kernel(x_ref, w_ref, b_ref, *refs, ksize, tile_w, win_w,
                  whole_window, with_act, has_residual):
    """One (batch, lane-tile) grid step.

    x_ref: (C_in_pad, L_total)  padded input row for this batch; the block index
                                only changes with the batch axis, so it is
                                fetched once per batch and stays VMEM-resident
                                across the lane-tile axis.
    w_ref: (C_out, K*C_in_pad)  lane-dense flattened weight (grid-invariant).
    b_ref: (C_out, 1)           bias (grid-invariant).
    refs : [res_ref,] o_ref     optional residual tile + output tile, (C_out, tile_w).
    """
    o_ref = refs[-1]

    if whole_window:
        # Single lane tile: the whole resident row is the window (static load).
        xw = x_ref[...]
    else:
        # 128-aligned dynamic window: tile start is a multiple of 512 and the
        # loaded width (tile + halo rounded up to lane tiles) is a multiple of
        # 128, so the load is fully vreg-aligned.
        start = pl.multiple_of(pl.program_id(1) * tile_w, 128)
        xw = x_ref[:, pl.ds(start, win_w)]

    # In-kernel im2col: K statically shifted lane windows stacked on the sublane
    # axis -> a single MXU matmul per tile instead of K tiny ones.
    cols = jnp.concatenate([xw[:, k0:k0 + tile_w] for k0 in range(ksize)], axis=0)

    acc = jnp.dot(w_ref[...], cols, preferred_element_type=jnp.float32)
    acc = acc + b_ref[...]                      # f32 bias epilogue
    if with_act:
        acc = jnp.maximum(acc, 0.0)             # ReLU
    if has_residual:                            # fused residual (post-activation)
        acc = acc + refs[0][...].astype(jnp.float32)
    o_ref[...] = acc.astype(o_ref.dtype)


def conv_forward(x, weight, bias, *, stride=1, padding=1, with_act=True,
                 with_bn=False, add_residual=False, residual=None,
                 compute_dtype=None):
    """Equivalent of Conv.forward (with_bn=False, act_func='ReLU')."""
    if with_bn:
        # TODO(synk): BatchNorm1d (with_bn=True) has no implementation here.
        raise NotImplementedError("with_bn=True is not supported")

    n, c_in, l = x.shape
    c_out, _, k = weight.shape
    l_pad = l + 2 * padding
    l_out = (l_pad - k) // stride + 1
    out_dtype = x.dtype

    # Columns the kernel must produce per batch.
    # TODO(synk): for stride > 1 the kernel computes every valid column and the
    # wrapper strided-slices afterwards (~stride x extra work on that rare path).
    cols_needed = (l_out - 1) * stride + 1

    # ---- lane tiling --------------------------------------------------------
    if cols_needed <= 512:
        tile_w = cols_needed                   # one full-width tile, no padding
        num_w_tiles = 1
        w_out_pad = cols_needed
        halo_w = k - 1
    else:
        tile_w = 512                           # >=512 lanes: near HBM roofline
        w_out_pad = _round_up(cols_needed, tile_w)
        num_w_tiles = w_out_pad // tile_w
        if (n * num_w_tiles) % 2 == 1:         # keep parallel steps even (v7x 2 TCs)
            num_w_tiles += 1
            w_out_pad = num_w_tiles * tile_w
        halo_w = _round_up(k - 1, 128)         # 128-aligned in-kernel window width
    win_w = tile_w + halo_w
    whole_window = num_w_tiles == 1

    # ---- single fused pad: C_in -> sublane multiple, L -> conv pad + halo ----
    sub = 8
    if compute_dtype is not None and jnp.dtype(compute_dtype) == jnp.dtype(jnp.bfloat16):
        sub = 16                               # bf16 packs (16,128) vreg tiles
    c_in_pad = _round_up(c_in, sub)
    l_total = max((num_w_tiles - 1) * tile_w + win_w, l + 2 * padding)
    x_p = jnp.pad(x, ((0, 0), (0, c_in_pad - c_in),
                      (padding, l_total - l - padding)))
    if compute_dtype is not None:
        x_p = x_p.astype(compute_dtype)

    # (C_out, C_in, K) -> (C_out, K*C_in_pad); contraction index k*C_in_pad + c
    # matches the sublane stacking order of the in-kernel im2col.
    w_padded = jnp.pad(weight, ((0, 0), (0, c_in_pad - c_in), (0, 0)))
    w_flat = jnp.transpose(w_padded, (0, 2, 1)).reshape(c_out, k * c_in_pad)
    if compute_dtype is not None:
        w_flat = w_flat.astype(compute_dtype)
    b2 = bias.reshape(c_out, 1).astype(jnp.float32)

    # ---- optional fused residual (post-activation, as in the module) --------
    fuse_residual = False
    res_in = None
    if add_residual:
        if residual is None:
            residual = x
        if residual.shape != (n, c_out, l_out):
            raise ValueError(
                f"residual shape {residual.shape} does not match output shape "
                f"{(n, c_out, l_out)}")
        if stride == 1:
            fuse_residual = True
            res_in = residual
            if w_out_pad != l_out:
                res_in = jnp.pad(res_in, ((0, 0), (0, 0), (0, w_out_pad - l_out)))

    in_specs = [
        # Full padded row per batch, resident across the lane-tile axis.
        pl.BlockSpec((pl.Squeezed(), c_in_pad, l_total), lambda b, t: (b, 0, 0)),
        # Grid-invariant weight / bias (fetched once).
        pl.BlockSpec((c_out, k * c_in_pad), lambda b, t: (0, 0)),
        pl.BlockSpec((c_out, 1), lambda b, t: (0, 0)),
    ]
    operands = [x_p, w_flat, b2]
    if fuse_residual:
        in_specs.append(
            pl.BlockSpec((pl.Squeezed(), c_out, tile_w), lambda b, t: (b, 0, t)))
        operands.append(res_in)

    out_specs = pl.BlockSpec((pl.Squeezed(), c_out, tile_w), lambda b, t: (b, 0, t))

    # VMEM budget (v7x: 64 MiB physical, 32 MiB scoped default).
    # TODO(synk): if the per-batch row no longer fits VMEM, switch x to
    # memory_space=pl.ANY with manual double-buffered async copies.
    op_itemsize = jnp.dtype(compute_dtype).itemsize if compute_dtype is not None \
        else jnp.dtype(out_dtype).itemsize
    est_vmem = (2 * c_in_pad * l_total * op_itemsize          # double-buffered x row
                + 2 * c_out * tile_w * jnp.dtype(out_dtype).itemsize
                + c_out * k * c_in_pad * op_itemsize          # resident weight
                + c_out * 4)                                  # bias
    if fuse_residual:
        est_vmem += 2 * c_out * tile_w * res_in.dtype.itemsize
    cp_kwargs = dict(dimension_semantics=("parallel", "parallel"))
    if est_vmem > 32 * 1024 * 1024:
        cp_kwargs["vmem_limit_bytes"] = int(min(est_vmem * 5 // 4, 100 * 1024 * 1024))

    out_full = pl.pallas_call(
        partial(conv1d_kernel, ksize=k, tile_w=tile_w, win_w=win_w,
                whole_window=whole_window, with_act=with_act,
                has_residual=fuse_residual),
        out_shape=jax.ShapeDtypeStruct((n, c_out, w_out_pad), out_dtype),
        grid=(n, num_w_tiles),
        in_specs=in_specs,
        out_specs=out_specs,
        compiler_params=pltpu.CompilerParams(**cp_kwargs),
    )(*operands)

    # Common case (stride==1, exact width): zero post-kernel layout ops.
    if stride == 1:
        out = out_full if w_out_pad == l_out else out_full[:, :, :l_out]
    else:
        out = out_full[:, :, :(l_out - 1) * stride + 1:stride]

    if add_residual and not fuse_residual:
        out = residual + out
    return out


if __name__ == "__main__":
    # Module config: Conv(in_channels=4, out_channels=8, kernel_size=3,
    # stride=1, padding=1), defaults with_act=True, with_bn=False.
    N, C_IN, L = 2, 4, 16
    C_OUT, K, STRIDE, PAD = 8, 3, 1, 1

    key = jax.random.PRNGKey(0)
    kx, kw, kb, kr = jax.random.split(key, 4)

    x = jax.random.normal(kx, (N, C_IN, L), dtype=jnp.float32)
    # Deterministic parameter init (kaiming-uniform-like scale for Conv1d).
    fan_in = C_IN * K
    bound = 1.0 / (fan_in ** 0.5)
    weight = jax.random.uniform(
        kw, (C_OUT, C_IN, K), minval=-bound, maxval=bound, dtype=jnp.float32)
    bias = jax.random.uniform(
        kb, (C_OUT,), minval=-bound, maxval=bound, dtype=jnp.float32)

    # Default path: conv + ReLU, no residual.
    out = conv_forward(x, weight, bias, stride=STRIDE, padding=PAD,
                       with_act=True, add_residual=False)
    out = jax.block_until_ready(out)

    ref = jax.lax.conv_general_dilated(
        x, weight, window_strides=(STRIDE,), padding=[(PAD, PAD)],
        dimension_numbers=("NCH", "OIH", "NCH")) + bias.reshape(1, C_OUT, 1)
    ref = jnp.maximum(ref, 0.0)
    assert out.shape == (N, C_OUT, (L + 2 * PAD - K) // STRIDE + 1)
    assert jnp.allclose(out, ref, atol=1e-5, rtol=1e-5)

    # Fused-residual path (residual added after activation, as in the module).
    residual = jax.random.normal(kr, (N, C_OUT, L), dtype=jnp.float32)
    out_res = conv_forward(x, weight, bias, stride=STRIDE, padding=PAD,
                           with_act=True, add_residual=True, residual=residual)
    out_res = jax.block_until_ready(out_res)
    assert jnp.allclose(out_res, ref + residual, atol=1e-5, rtol=1e-5)

    print("KERNEL_OK")
</pallas_src>

<mosaic_0001>
module attributes {stable_mosaic.version = 11 : i64} {
  func.func @conv1d_kernel(%arg0: i32, %arg1: i32, %arg2: memref<1x8x18xf32, #tpu.memory_space<vmem>>, %arg3: memref<8x24xf32, #tpu.memory_space<vmem>>, %arg4: memref<8x1xf32, #tpu.memory_space<vmem>>, %arg5: memref<1x8x16xf32, #tpu.memory_space<vmem>>) attributes {dimension_semantics = [#tpu.dimension_semantics<parallel>, #tpu.dimension_semantics<parallel>], iteration_bounds = array<i64: 2, 1>, scalar_prefetch = 0 : i64, scratch_operands = 0 : i64, tpu.core_type = #tpu.core_type<tc>, window_params = [{transform_indices = @transform_0, window_bounds = array<i64: 1, 8, 18>}, {pipeline_mode = #tpu.pipeline_mode<synchronous>, transform_indices = @transform_1, window_bounds = array<i64: 8, 24>}, {pipeline_mode = #tpu.pipeline_mode<synchronous>, transform_indices = @transform_2, window_bounds = array<i64: 8, 1>}, {transform_indices = @transform_3, window_bounds = array<i64: 1, 8, 16>}]} {
    %c0 = arith.constant 0 : index
    %c0_0 = arith.constant 0 : index
    %c0_1 = arith.constant 0 : index
    %0 = vector.load %arg2[%c0, %c0_0, %c0_1] : memref<1x8x18xf32, #tpu.memory_space<vmem>>, vector<1x8x18xf32>
    %1 = vector.shape_cast %0 : vector<1x8x18xf32> to vector<8x18xf32>
    %2 = vector.extract_strided_slice %1 {offsets = [0, 0], sizes = [8, 16], strides = [1, 1]} : vector<8x18xf32> to vector<8x16xf32>
    %3 = vector.extract_strided_slice %1 {offsets = [0, 1], sizes = [8, 16], strides = [1, 1]} : vector<8x18xf32> to vector<8x16xf32>
    %4 = vector.extract_strided_slice %1 {offsets = [0, 2], sizes = [8, 16], strides = [1, 1]} : vector<8x18xf32> to vector<8x16xf32>
    %5 = tpu.concatenate %2, %3, %4 in 0 : vector<8x16xf32>, vector<8x16xf32>, vector<8x16xf32> -> vector<24x16xf32>
    %c0_2 = arith.constant 0 : index
    %c0_3 = arith.constant 0 : index
    %6 = vector.load %arg3[%c0_2, %c0_3] : memref<8x24xf32, #tpu.memory_space<vmem>>, vector<8x24xf32>
    %cst = arith.constant dense<0.000000e+00> : vector<8x16xf32>
    %7 = tpu.matmul %6, %5, %cst {dimension_numbers = #tpu.dot_dimension_numbers<[1], [0], [0], [1], [0, 0, 1, 1], [], []>} : vector<8x24xf32>, vector<24x16xf32>, vector<8x16xf32> -> vector<8x16xf32>
    %c0_4 = arith.constant 0 : index
    %c0_5 = arith.constant 0 : index
    %8 = vector.load %arg4[%c0_4, %c0_5] : memref<8x1xf32, #tpu.memory_space<vmem>>, vector<8x1xf32>
    %9 = vector.broadcast %8 : vector<8x1xf32> to vector<8x16xf32>
    %10 = arith.addf %7, %9 : vector<8x16xf32>
    %cst_6 = arith.constant 0.000000e+00 : f32
    %11 = vector.broadcast %cst_6 : f32 to vector<8x16xf32>
    %12 = arith.maximumf %10, %11 : vector<8x16xf32>
    %c0_7 = arith.constant 0 : index
    %c0_8 = arith.constant 0 : index
    %c0_9 = arith.constant 0 : index
    %13 = vector.load %arg5[%c0_7, %c0_8, %c0_9] : memref<1x8x16xf32, #tpu.memory_space<vmem>>, vector<1x8x16xf32>
    %14 = vector.shape_cast %13 : vector<1x8x16xf32> to vector<8x16xf32>
    %15 = vector.shape_cast %12 : vector<8x16xf32> to vector<1x8x16xf32>
    tpu.vector_store %arg5[%c0_7, %c0_8, %c0_9], %15 {strides = array<i32>} : memref<1x8x16xf32, #tpu.memory_space<vmem>>, vector<1x8x16xf32>,
    return
  }
  func.func @transform_0(%arg0: i32, %arg1: i32) -> (i32, i32, i32) {
    %c0_i32 = arith.constant 0 : i32
    %c0_i32_0 = arith.constant 0 : i32
    %c0_i32_1 = arith.constant 0 : i32
    return %arg0, %c0_i32, %c0_i32_0 : i32, i32, i32
  }
  func.func @transform_1(%arg0: i32, %arg1: i32) -> (i32, i32) {
    %c0_i32 = arith.constant 0 : i32
    %c0_i32_0 = arith.constant 0 : i32
    %c0_i32_1 = arith.constant 0 : i32
    return %c0_i32, %c0_i32_0 : i32, i32
  }
  func.func @transform_2(%arg0: i32, %arg1: i32) -> (i32, i32) {
    %c0_i32 = arith.constant 0 : i32
    %c0_i32_0 = arith.constant 0 : i32
    %c0_i32_1 = arith.constant 0 : i32
    return %c0_i32, %c0_i32_0 : i32, i32
  }
  func.func @transform_3(%arg0: i32, %arg1: i32) -> (i32, i32, i32) {
    %c0_i32 = arith.constant 0 : i32
    %c0_i32_0 = arith.constant 0 : i32
    return %arg0, %c0_i32, %arg1 : i32, i32, i32
  }
}

</mosaic_0001>

<bundles_post_ra>
// kernel: tpu_custom_call.1
= control target key start
LH: loop header
LB: loop body
LE: loop exit
PB: predicated region body
PF: predicated region fallthrough
CT: control target
= control target key end

     0   :  { %8 = vsyncpa [#allocation3], 0  ;;  %s810_s0 = inlined_call_operand.hbm [shape: f32[2,8,18], index: 0, kind: input, shape index: {}]   ;;  %s811_s1 = inlined_call_operand.vmem [shape: f32[8,24], index: 1, kind: input, shape index: {}]   ;;  %s812_s2 = inlined_call_operand.vmem [shape: f32[8,1], index: 2, kind: input, shape index: {}]   ;;  %s813_s3 = inlined_call_operand.hbm [shape: f32[2,8,16], index: 3, kind: output, shape index: {}]  }
   0x1   :  { %10 = vsyncpa [#allocation3 + $0x1], 0 }
   0x2   :  { %11 = vsyncpa [#allocation4], 0 }
   0x3   :  { %13 = vsyncpa [#allocation4 + $0x1], 0  ;;  %s628_s12 = smov 0   ;;  %s630_s13 = smov 0  }
   0x4   :  { %s632_s14 = smov 0   ;;  %s634_s15 = smov 0  }
   0x5   :  { %s636_s16 = smov 0   ;;  %s638_s17 = smov 0  }
   0x6 LB: > { %s386_s18 = sadd.s32 4294967295, %s598_s17   ;;  %s387_s19 = sadd.s32 4294967294, %s598_s17   ;;  %s598_s17 = sphi %s638_s17, %s19_s17   ;;  %s594_s16 = sphi %s636_s16, %s829_s16   ;;  %s590_s15 = sphi %s634_s15, %s828_s15   ;;  %s586_s14 = sphi %s632_s14, %s827_s14   ;;  %s582_s13 = sphi %s630_s13, %s826_s13   ;;  %s578_s12 = sphi %s628_s12, %s825_s12  }
   0x7   : > { %s31_s20 = sadd.s32 1, %s594_s16  ;;  %s38_s21 = sadd.s32 1, %s586_s14 }
   0x8   : > { %p33_p0 = scmp.ge.s32.totalorder %s31_s20, 2  ;;  %p45_p1 = scmp.ne.s32.totalorder %s586_s14, %s582_s13 }
   0x9   : > { %p46_p2 = scmp.eq.s32.totalorder %s598_s17, 0  ;;  %p51_p3 = scmp.ne.s32.totalorder %s582_s13, %s578_s12 }
   0xa   : > { %s831_s20 = smov (%p33_p0, %s31_s20), 0  ;;  %p52_p5 = scmp.eq.s32.totalorder %s386_s18, 0 }
   0xb   : > { %p669_p4 = por %p46_p2, %p45_p1  ;;  %s35_s23 = ssub.s32 %s594_s16, %s831_s20 }
   0xc   : > { %p119_p6 = scmp.eq.s32.totalorder %s386_s18, 1  ;;  %p36_p7 = scmp.eq.s32.totalorder %s35_s23, 0 }
   0xd   : > { %p675_p8 = por %p52_p5, %p51_p3  ;;  %p125_p10 = scmp.eq.s32.totalorder %s387_s19, 1 }
   0xe   : > { %p679_p9 = por %p119_p6, %p45_p1  ;;  %p428_p13 = scmp.lt.s32.totalorder %s598_s17, 2 }
   0xf   : > { %s684_s26 = scalar_select %p36_p7, %s586_s14, %s38_s21  }
  0x10   : > { %s817_s25 = scalar_select %p679_p9, 1, 0 }
  0x11   : > { %p686_p11 = por %p125_p10, %p51_p3  ;;  %s151_s28 = sand.u32 1, %s586_s14  }
  0x12   : > { %s390_s29 = sshll.u32 %s151_s28, 3  ;;  %s391_s30 = sshll.u32 %s594_s16, 7 }
  0x13   : > { %s818_s27 = scalar_select %p686_p11, 1, 0 }
  0x14   : > { %s697_s6 = scalar_lea.hbm %s810_s0, %s391_s30  ;;  %s155_s7 = scalar_lea.vmem [#allocation2], %s390_s29 }
  0x15   : > { %s162_s8 = sshll.u32 %s155_s7, 4  ;;  %p703_p0 = pnand %p428_p13, %p669_p4  ;;  %s699_s8 = int_to_ptr.vmem [resolvable:$true] %s162_s8 }
  0x16   : > { %s152_s10 = scalar_lea.sflag [#allocation3], %s151_s28  ;;  %s486_s11 = scalar_lea.hbm %s697_s6, 128 }
  0x17   : > { %p487_p3 = scmp.ne.s32.totalorder %s697_s6, %s486_s11  ;;  %p488_p5 = pneg %p703_p0 }
  0x18   : > { %s491_s21 = scalar_lea.hbm %s810_s0, 256  ;;  %p492_p4 = scmp.lt.u32.totalorder %s697_s6, %s810_s0 }
  0x19   : > { %p489_p6 = pnand %p488_p5, %p487_p3  ;;  %p493_p10 = scmp.lt.u32.totalorder %s491_s21, %s486_s11 }
  0x1a   : > { %p495_p12 = scmp.lt.u32.totalorder %s486_s11, %s697_s6 }
  0x1b   : > { %p490_p7 = pneg %p489_p6  ;;  %p494_p13 = por %p493_p10, %p492_p4 }
  0x1d   : > { %p496_p1 = por %p495_p12, %p494_p13 }
  0x1f   : > { %p497_p2 = pnand %p496_p1, %p490_p7 }
  0x21   : > { %500 = shalt.err (!%p497_p2)
}
  0x22   : > { %s501_s28 = scalar_lea.vmem %s699_s8, 128  ;;  %s600_s29 = smov [#allocation2]  }
  0x23   : > { %p502_p3 = scmp.ne.s32.totalorder %s699_s8, %s501_s28  ;;  %s506_s30 = sshll.u32 %s600_s29, 4  ;;  %s507_s30 = int_to_ptr.vmem [resolvable:$false] %s506_s30 }
  0x24   : > { %s508_s4 = scalar_lea.vmem %s507_s30, 256  ;;  %p509_p9 = scmp.lt.s32.totalorder %s699_s8, %s507_s30 }
  0x25   : > { %p504_p6 = pnand %p502_p3, %p488_p5  ;;  %p510_p4 = scmp.lt.s32.totalorder %s508_s4, %s501_s28 }
  0x27   : > { %p505_p11 = pneg %p504_p6  ;;  %p511_p10 = por %p510_p4, %p509_p9 }
  0x29   : > { %p512_p12 = pnand %p511_p10, %p505_p11 }
  0x2b   : > { %515 = shalt.err (!%p512_p12)
}
  0x2c   : > { %423 = dma.hbm_to_vmem [thread:$0]  (!%p703_p0), %s697_s6, 128, %s699_s8, %s152_s10  }
  0x2d   : > { %p820_p1 = scmp.lt.s32.totalorder %s598_s17, 3  ;;  %p821_p2 = scmp.ge.s32.totalorder %s598_s17, 1 }
  0x2f   : > { %p168_p5 = pnand %p821_p2, %p820_p1 }
  0x30   : > { %s739_s5 = sand.u32 (!%p168_p5), 1, %s582_s13  }
  0x31   : > { %171 = sbr.rel (%p168_p5) target bundleno = 412 (0x19c), region = 32  ;;  %s393_s7 = sshll.u32 (!%p168_p5), %s739_s5, 3 }
  0x32   : > { %s174_s11 = scalar_lea.sflag (!%p168_p5), [#allocation3], %s739_s5  ;;  %s177_s9 = scalar_lea.vmem (!%p168_p5), [#allocation2], %s393_s7 }
  0x38   : > { %569 = dma.done.wait (%p675_p8), %s174_s11, 128  }
  0x39   : > { %571 = vsyncadd (%p675_p8), %s174_s11, 4294967168  ;;  %v601_v0 = vmov 0.0|0.0   ;;  %vm602_vm0 = vmmov 0   ;;  %v603_v1 = vmov 0.0   ;;  %v604_v2 = vmov 0   ;;  %v200_v3 = vld [vmem:[%s177_s9] sm:$0xff] }
  0x3a   : > { %413 = vmatprep.subr.bf16.mxu0 %v601_v0  ;;  %410 = vmatprep.mubr.msk.f32.mxu0 %vm602_vm0, %v603_v1  ;;  %v209_v4 = vld [vmem:[%s812_s2] sm:$0xff]  ;;  %s605_s10 = smov 127   ;;  %s606_s24 = smov 126   ;;  %vm215_vm1 = vcmask 195584   ;;  %vm290_vm2 = vcmask 130048  }
  0x3b   : > { %484 = vset.pattern.permute.xlu1 %v604_v2  ;;  %485 = vset.pattern.permute.xlu0 %v604_v2  ;;  %v208_v8 = vld [vmem:[%s811_s1] sm:$0xff]  ;;  %s397_s21 = sshll.u32 %s590_s15, 7  ;;  %s199_s22 = scalar_lea.vmem [#allocation5], %s393_s7 }
  0x3c   : > { %202 = vrot.lane.b32.xlu0 %v200_v3, %s605_s10  ;;  %212 = vperm.xlu1 %484, %v209_v4   ;;  %s307_s23 = sshll.u32 %s199_s22, 4  ;;  %s761_s30 = scalar_lea.hbm %s813_s3, %s397_s21  ;;  %s763_s23 = int_to_ptr.vmem [resolvable:$true] %s307_s23 }
  0x3d   : > { %s293_s4 = scalar_lea.sflag [#allocation4], %s739_s5  ;;  %s516_s15 = scalar_lea.vmem %s763_s23, 128 }
  0x3e   : > { %p517_p8 = scmp.ne.s32.totalorder %s763_s23, %s516_s15  ;;  %p822_p9 = scmp.ne.s32.totalorder %s817_s25, 0 }
  0x3f   : > { %s607_s7 = smov [#allocation5]  }
  0x40   : > { %205 = vrot.lane.b32.xlu0 %v200_v3, %s606_s24  ;;  %p518_p11 = pnand %p517_p8, %p822_p9  ;;  %s520_s11 = sshll.u32 %s607_s7, 4  ;;  %s521_s11 = int_to_ptr.vmem [resolvable:$false] %s520_s11 }
  0x41   : > { %s522_s9 = scalar_lea.vmem %s521_s11, 256  ;;  %p523_p7 = scmp.lt.s32.totalorder %s763_s23, %s521_s11 }
  0x42   : > { %p519_p0 = pneg %p518_p11  ;;  %p524_p13 = scmp.lt.s32.totalorder %s522_s9, %s516_s15 }
  0x44   : > { %p525_p3 = por %p524_p13, %p523_p7 }
  0x46   : > { %p526_p6 = pnand %p525_p3, %p519_p0 }
  0xae   : > { %v203_v5 = vpop.permute.xlu0 %202 }
  0xaf   : > { %v414_v6 = vpack.c.bf16 %v203_v5, %v200_v3 }
  0xb1   : > { %415 = vmatpush3.bf16.msra.mxu0 %v414_v6 }
  0xb2   : > { %408 = vmatprep.subr.mxu0 %v603_v1  ;;  %v206_v7 = vpop.permute.xlu0 %205 }
  0xb5   : > { %409 = vmatpush3.msra.mxu0 %v206_v7 }
  0xb6   : > { %411 = vmatmul.mubr.msk.f32.vlgmr.msra.gmra.mrb[0].mxu0 %vm215_vm1, %v208_v8 }
  0xbb   : > { %v213_v9 = vpop.permute.xlu1 %212 }
 0x189   : > { %v285_v10 = vpop.f32.mrb[0].mxu0 }
 0x18a   : > { %v286_v11 = vadd.f32 %v285_v10, %v213_v9  ;;  %v412_v12 = vpop.f32.mrb[1].mxu0 }
 0x18c   : > { %v289_v13 = vmax.f32 %v286_v11, 0.0 }
 0x18e   : > { %291 = vst.msk [vmem:[%s199_s22] sm:$0xff] %vm290_vm2, %v289_v13 }
 0x18f   : > { %529 = shalt.err (!%p526_p6)
}
 0x190   : > { %s530_s5 = scalar_lea.hbm %s761_s30, 128  ;;  %s534_s10 = scalar_lea.hbm %s813_s3, 256 }
 0x191   : > { %p531_p4 = scmp.ne.s32.totalorder %s761_s30, %s530_s5  ;;  %p535_p1 = scmp.lt.u32.totalorder %s761_s30, %s813_s3 }
 0x192   : > { %p536_p2 = scmp.lt.u32.totalorder %s534_s10, %s530_s5  ;;  %p538_p8 = scmp.lt.u32.totalorder %s530_s5, %s761_s30 }
 0x193   : > { %p532_p10 = pnand %p531_p4, %p822_p9 }
 0x194   : > { %p537_p5 = por %p536_p2, %p535_p1 }
 0x195   : > { %p533_p12 = pneg %p532_p10 }
 0x196   : > { %p539_p11 = por %p538_p8, %p537_p5 }
 0x198   : > { %p540_p0 = pnand %p539_p11, %p533_p12 }
 0x19a   : > { %543 = shalt.err (!%p540_p0)
}
 0x19b   : > { %418 = dma.vmem_to_hbm [thread:$0]  (%p822_p9), %s763_s23, 128, %s761_s30, %s293_s4  }
 0x19c PF: > { %s319_s19 = sand.u32 1, %s578_s12   ;;  %p823_p7 = scmp.ne.s32.totalorder %s818_s27, 0 }
 0x19d   : > { %p824_p13 = scmp.ge.s32.totalorder %s598_s17, 2  ;;  %s320_s21 = scalar_lea.sflag [#allocation4], %s319_s19 }
 0x19f   : > { %p425_p3 = pnand %p824_p13, %p823_p7 }
 0x1a1   : > { %573 = dma.done.wait (!%p425_p3), %s320_s21, 128  }
 0x1a2   : > { %575 = vsyncadd (!%p425_p3), %s320_s21, 4294967168  ;;  %s19_s17 = sadd.s32 1, %s598_s17   ;;  %s825_s12 = smov %s582_s13 }
 0x1a3   : > { %p16_p6 = scmp.ge.s32.totalorder %s19_s17, 4   ;;  %s826_s13 = smov %s586_s14 }
 0x1a4   : > { %s827_s14 = smov %s684_s26  ;;  %s828_s15 = smov %s594_s16 }
 0x1a5   : > { %s829_s16 = smov %s831_s20  ;;  %18 = sbr.rel (!%p16_p6) target bundleno = 6 (0x6), region = 77 }
 0x1ac   :  { %325 = vsyncpa [#allocation3], 1 }
 0x1ad   :  { %327 = vsyncpa [#allocation3 + $0x1], 1 }
 0x1ae   :  { %328 = vsyncpa [#allocation4], 1 }
 0x1af   :  { %330 = vsyncpa [#allocation4 + $0x1], 1 }

</bundles_post_ra>
